<compile_context>
chip_gen: v5e
topology: v5e:2x2
jax: 0.10.0
libtpu: 0.0.40
codegen_flags: <defaults>
</compile_context>

<pallas_src>
import jax
import jax.numpy as jnp
from jax.experimental import pallas as pl
from jax.experimental.pallas import tpu as pltpu

LANES = 128
BLOCK_ROWS = 8192            # (8192, 128) f32 block = 4 MiB
TILE = BLOCK_ROWS * LANES    # elements per full grid step


def quadratic_kernel(params_ref, x_ref, o_ref):
    # params_ref: SMEM (3,) -> a, b, c scalars (read once per grid step)
    a = params_ref[0]
    b = params_ref[1]
    c = params_ref[2]
    xv = x_ref[...]
    # Horner form: a + x*(b + c*x)  (one fewer VPU multiply than a + b*x + c*x*x)
    o_ref[...] = a + xv * (b + c * xv)


def _quadratic_2d(params, x2d):
    """x2d: (rows, 128). Single gridded call; last block may be partial (masked)."""
    rows = x2d.shape[0]
    # Full-array block for small inputs (block == array dims is exempt from the
    # (8,128) divisibility rule); otherwise 4 MiB blocks with a partial tail block.
    block_rows = min(BLOCK_ROWS, rows)
    n_elems = rows * LANES
    return pl.pallas_call(
        quadratic_kernel,
        out_shape=jax.ShapeDtypeStruct((rows, LANES), x2d.dtype),
        grid_spec=pltpu.PrefetchScalarGridSpec(
            num_scalar_prefetch=0,
            grid=(pl.cdiv(rows, block_rows),),
            in_specs=[
                pl.BlockSpec(memory_space=pltpu.SMEM),                 # (3,) scalars
                pl.BlockSpec((block_rows, LANES), lambda i: (i, 0)),
            ],
            out_specs=pl.BlockSpec((block_rows, LANES), lambda i: (i, 0)),
        ),
        compiler_params=pltpu.CompilerParams(
            dimension_semantics=("parallel",),      # shards grid across v7x's 2 TCs
            vmem_limit_bytes=40 << 20,              # 16 MiB live + headroom
        ),
        cost_estimate=pl.CostEstimate(
            flops=3 * n_elems,
            transcendentals=0,
            bytes_accessed=2 * 4 * n_elems,         # read x + write y, f32
        ),
    )(params, x2d)


@jax.jit
def quadratic_forward(params, x):
    """params: (3,) float32 [a, b, c]; x: 1-D float32 vector of any length."""
    n = x.shape[0]
    rows = pl.cdiv(n, LANES)
    pad = rows * LANES - n
    # Pad at most 127 elements so x is a lane-dense (rows, 128) slab; the
    # ragged *row* remainder (rows % BLOCK_ROWS) is handled by the partial
    # last grid block inside the single pallas_call (OOB writes masked).
    x2d = (jnp.pad(x, (0, pad)) if pad else x).reshape(rows, LANES)
    y = _quadratic_2d(params, x2d).reshape(-1)
    return y[:n] if pad else y


if __name__ == "__main__":
    key = jax.random.PRNGKey(0)
    ka, kb, kc = jax.random.split(key, 3)
    # deterministic scalar parameters (mirrors torch.randn(()) x3)
    a = jax.random.normal(ka, ())
    b = jax.random.normal(kb, ())
    c = jax.random.normal(kc, ())
    params = jnp.stack([a, b, c]).astype(jnp.float32)

    # input analogous to torch.linspace(-3, 1, 4000) -> small single-block path
    x = jnp.linspace(-3.0, 1.0, 4000, dtype=jnp.float32)
    y = jax.block_until_ready(quadratic_forward(params, x))
    y_ref = a + b * x + c * x ** 2
    assert y.shape == x.shape
    assert jnp.allclose(y, y_ref, atol=1e-5, rtol=1e-5)

    # also exercise the gridded path with a ragged tail (n % 128 != 0 and
    # rows % BLOCK_ROWS != 0) -- all handled inside ONE pallas_call now.
    x2 = jnp.linspace(-3.0, 1.0, 2 * TILE + 1000, dtype=jnp.float32)
    y2 = jax.block_until_ready(quadratic_forward(params, x2))
    y2_ref = a + b * x2 + c * x2 ** 2
    assert y2.shape == x2.shape
    assert jnp.allclose(y2, y2_ref, atol=1e-5, rtol=1e-5)

    print("KERNEL_OK")
</pallas_src>

<mosaic_0001>
module attributes {stable_mosaic.version = 11 : i64} {
  func.func @quadratic_kernel(%arg0: i32, %arg1: memref<3xf32, #tpu.memory_space<smem>>, %arg2: memref<32x128xf32, #tpu.memory_space<vmem>>, %arg3: memref<32x128xf32, #tpu.memory_space<vmem>>) attributes {dimension_semantics = [#tpu.dimension_semantics<parallel>], iteration_bounds = array<i64: 1>, scalar_prefetch = 0 : i64, scratch_operands = 0 : i64, tpu.core_type = #tpu.core_type<tc>, window_params = [{transform_indices = @transform_0, window_bounds = array<i64: 3>}, {transform_indices = @transform_1, window_bounds = array<i64: 32, 128>}, {transform_indices = @transform_2, window_bounds = array<i64: 32, 128>}]} {
    %c0 = arith.constant 0 : index
    %0 = memref.load %arg1[%c0] : memref<3xf32, #tpu.memory_space<smem>>
    %c1 = arith.constant 1 : index
    %1 = memref.load %arg1[%c1] : memref<3xf32, #tpu.memory_space<smem>>
    %c2 = arith.constant 2 : index
    %2 = memref.load %arg1[%c2] : memref<3xf32, #tpu.memory_space<smem>>
    %c0_0 = arith.constant 0 : index
    %c0_1 = arith.constant 0 : index
    %3 = vector.load %arg2[%c0_0, %c0_1] : memref<32x128xf32, #tpu.memory_space<vmem>>, vector<32x128xf32>
    %4 = vector.broadcast %2 : f32 to vector<32x128xf32>
    %5 = arith.mulf %4, %3 : vector<32x128xf32>
    %6 = vector.broadcast %1 : f32 to vector<32x128xf32>
    %7 = arith.addf %6, %5 : vector<32x128xf32>
    %8 = arith.mulf %3, %7 : vector<32x128xf32>
    %9 = vector.broadcast %0 : f32 to vector<32x128xf32>
    %10 = arith.addf %9, %8 : vector<32x128xf32>
    %c0_2 = arith.constant 0 : index
    %c0_3 = arith.constant 0 : index
    %11 = vector.load %arg3[%c0_2, %c0_3] : memref<32x128xf32, #tpu.memory_space<vmem>>, vector<32x128xf32>
    tpu.vector_store %arg3[%c0_2, %c0_3], %10 {strides = array<i32>} : memref<32x128xf32, #tpu.memory_space<vmem>>, vector<32x128xf32>,
    return
  }
  func.func @transform_0(%arg0: i32) -> i32 {
    %c0_i32 = arith.constant 0 : i32
    %c0_i32_0 = arith.constant 0 : i32
    return %c0_i32 : i32
  }
  func.func @transform_1(%arg0: i32) -> (i32, i32) {
    %c0_i32 = arith.constant 0 : i32
    %c0_i32_0 = arith.constant 0 : i32
    return %arg0, %c0_i32 : i32, i32
  }
  func.func @transform_2(%arg0: i32) -> (i32, i32) {
    %c0_i32 = arith.constant 0 : i32
    %c0_i32_0 = arith.constant 0 : i32
    return %arg0, %c0_i32 : i32, i32
  }
}

</mosaic_0001>

<bundles_post_ra>
// kernel: quadratic_forward.1
= control target key start
LH: loop header
LB: loop body
LE: loop exit
PB: predicated region body
PF: predicated region fallthrough
CT: control target
= control target key end

     0   :  { %7 = vsyncpa [#allocation4], 0  ;;  %s157_s0 = inlined_call_operand.vmem [shape: f32[3], index: 0, kind: input, shape index: {}]   ;;  %s158_s1 = inlined_call_operand.vmem [shape: f32[32,128], index: 1, kind: input, shape index: {}]   ;;  %s159_s2 = inlined_call_operand.hbm [shape: f32[32,128], index: 2, kind: output, shape index: {}]  }
   0x1   :  { %8 = vsyncpa [#allocation3], 0  ;;  %s14_s11 = sshll.u32 %s157_s0, 4  ;;  %s120_s12 = smov [#allocation2]   ;;  %s15_s11 = int_to_ptr.vmem [resolvable:$true] %s14_s11 }
   0x2   :  { %17 = dma.vmem_to_smem %s15_s11, 16, %s120_s12, [#allocation4]  }
   0x3   :  { %116 = dma.done.wait [#allocation4], 16  }
   0x4   :  { %117 = vsyncadd [#allocation4], 4294967280 }
   0x5   :  { %24 = sfence }
   0x6   :  { %s74_s13 = sld [smem:[#allocation2 + $0x1]]  ;;  %v28_v0 = vld [vmem:[%s158_s1] sm:$0xff]  ;;  %v29_v1 = vld [vmem:[%s158_s1 + $0x8] sm:$0xff]  ;;  %v30_v2 = vld [vmem:[%s158_s1 + $0x10] sm:$0xff]  ;;  %s121_s23 = smov [#allocation5]  }
   0x7   :  { %s75_s14 = sld [smem:[#allocation2 + $0x2]]  ;;  %v31_v3 = vld [vmem:[%s158_s1 + $0x18] sm:$0xff]  ;;  %s59_s24 = sshll.u32 %s121_s23, 4  ;;  %s60_s24 = int_to_ptr.vmem [resolvable:$true] %s59_s24 }
   0x8   :  { %s25_s15 = sld [smem:[#allocation2]]  ;;  %s61_s26 = sshll.u32 %s159_s2, 4  ;;  %s62_s26 = int_to_ptr.hbm [resolvable:$true] %s61_s26 }
   0x9   :  { %s122_s27 = smov 128   ;;  %s123_s28 = smov 8  }
   0xc   :  { %v37_v5 = vstv %s74_s13 }
   0xd   :  { %v32_v4 = vstv %s75_s14 }
   0xe   :  { %v33_v6 = vmul.f32 %v32_v4, %v28_v0  ;;  %v34_v7 = vmul.f32 %v32_v4, %v29_v1  ;;  %v35_v8 = vmul.f32 %v32_v4, %v30_v2  ;;  %v36_v9 = vmul.f32 %v32_v4, %v31_v3 }
   0xf   :  { %v46_v14 = vstv %s25_s15 }
  0x10   :  { %v38_v10 = vadd.f32 %v37_v5, %v33_v6  ;;  %v39_v11 = vadd.f32 %v37_v5, %v34_v7  ;;  %v40_v12 = vadd.f32 %v37_v5, %v35_v8  ;;  %v41_v13 = vadd.f32 %v37_v5, %v36_v9 }
  0x12   :  { %v42_v15 = vmul.f32 %v38_v10, %v28_v0  ;;  %v43_v16 = vmul.f32 %v39_v11, %v29_v1  ;;  %v44_v17 = vmul.f32 %v40_v12, %v30_v2  ;;  %v45_v18 = vmul.f32 %v41_v13, %v31_v3 }
  0x14   :  { %v47_v19 = vadd.f32 %v46_v14, %v42_v15  ;;  %v48_v20 = vadd.f32 %v46_v14, %v43_v16  ;;  %v49_v21 = vadd.f32 %v46_v14, %v44_v17  ;;  %v50_v22 = vadd.f32 %v46_v14, %v45_v18 }
  0x16   :  { %51 = vst [vmem:[#allocation5] sm:$0xff] %v47_v19 }
  0x17   :  { %52 = vst [vmem:[#allocation5 + $0x8] sm:$0xff] %v48_v20 }
  0x18   :  { %53 = vst [vmem:[#allocation5 + $0x10] sm:$0xff] %v49_v21 }
  0x19   :  { %54 = vst [vmem:[#allocation5 + $0x18] sm:$0xff] %v50_v22 }
  0x1a   :  { %67 = dma.vmem_to_hbm [thread:$0]  %s60_s24, 512, %s62_s26, [#allocation3], %s122_s27, %s122_s27, %s123_s28  }
  0x1b   :  { %118 = dma.done.wait [#allocation3], 512  }
  0x1c   :  { %119 = vsyncadd [#allocation3], 4294966784 }
  0x1d   :  { %72 = vsyncpa [#allocation3], 1 }
  0x1e   :  { %73 = vsyncpa [#allocation4], 1 }

</bundles_post_ra>
